<compile_context>
chip_gen: v7x
topology: tpu7x:2x2x1
jax: 0.10.0
libtpu: 0.0.40
codegen_flags: <defaults>
</compile_context>

<pallas_src>
import numpy as np
import jax
import jax.numpy as jnp
from jax.experimental import pallas as pl
from jax.experimental.pallas import tpu as pltpu

# ----------------------------- configuration -------------------------------
B, T = 2, 1                 # use_recurrent=None  => seq_length must be 1
C, H, W = 3, 16, 16         # rgb image
GOAL_DIM = 16
STATE_DIM = 32              # backbone output feature dim
HIDDEN = 32
ACTION_SPACE = [4, 4, 8]
ACT_PRED_DIM = sum(ACTION_SPACE)   # 16
IMG_FLAT = C * H * W               # 768 (a 128-lane multiple)
LHS_K = IMG_FLAT + GOAL_DIM        # 784  K-concat LHS width
C0_K = STATE_DIM + GOAL_DIM        # 48   concat_input[0] LHS width

# packed-weight row offsets (all multiples of the bf16 sublane pack of 16)
_OFF_BB = 0                        # rows   0:784  [wbb_img ; wg@wbb_goal]
_OFF_C0 = LHS_K                    # rows 784:832  [wrgb@c0r ; wg@c0g]
_OFF_HH = LHS_K + C0_K             # rows 832:992  c1, c2, c3@a0, a1, a2(pad)
W_ROWS = _OFF_HH + 5 * HIDDEN      # 992


# ------------------------------- kernel ------------------------------------
def simple_network_kernel(x_ref, w_ref, b_ref, out_ref):
    f32 = jnp.float32
    bf16 = jnp.bfloat16

    def relu(v):
        return jnp.maximum(v, 0.0)

    b = b_ref[...]                         # (7, HIDDEN) f32
    x = x_ref[...]                         # (N, 784)    bf16 = [img | goals]

    # backbone: feat = relu([img|goals] @ [wbb_img ; wg@wbb_goal] + folded bias)
    feat = relu(
        jnp.dot(x, w_ref[_OFF_BB:_OFF_BB + LHS_K, :], preferred_element_type=f32)
        + b[0:1]
    )

    # concat_input layer 0 with embed_rgb and embed_goal folded in; the bf16
    # goal features are reused straight from the K-concat LHS (lanes 768:784).
    z = jnp.concatenate([feat.astype(bf16), x[:, IMG_FLAT:LHS_K]], axis=-1)  # (N, 48)
    h = relu(
        jnp.dot(z, w_ref[_OFF_C0:_OFF_C0 + C0_K, :], preferred_element_type=f32)
        + b[1:2]
    )

    # concat_input layers 1, 2 (Linear-ReLU)
    h = relu(jnp.dot(h.astype(bf16), w_ref[_OFF_HH:_OFF_HH + 32, :],
                     preferred_element_type=f32) + b[2:3])
    h = relu(jnp.dot(h.astype(bf16), w_ref[_OFF_HH + 32:_OFF_HH + 64, :],
                     preferred_element_type=f32) + b[3:4])
    # concat_input final Linear (c3) folded with action_head first Linear (a0)
    h = relu(jnp.dot(h.astype(bf16), w_ref[_OFF_HH + 64:_OFF_HH + 96, :],
                     preferred_element_type=f32) + b[4:5])
    # action_head layer 1 (Linear-ReLU)
    h = relu(jnp.dot(h.astype(bf16), w_ref[_OFF_HH + 96:_OFF_HH + 128, :],
                     preferred_element_type=f32) + b[5:6])
    # action_head final Linear (a2, lane-padded to HIDDEN; lane-dense store,
    # valid 16 columns are sliced in the wrapper)
    out_ref[...] = (
        jnp.dot(h.astype(bf16), w_ref[_OFF_HH + 128:_OFF_HH + 160, :],
                preferred_element_type=f32) + b[6:7]
    )


# ------------------------------- wrapper ------------------------------------
def simple_network_forward(goals, rgb, packed):
    """goals: (B, T, GOAL_DIM) f32; rgb: (B, T, C, H, W) f32 (NCHW like PyTorch)."""
    w_packed, biases = packed
    Bsz, Tlen = rgb.shape[:2]
    N = Bsz * Tlen
    img_2d = rgb.reshape(N, IMG_FLAT).astype(jnp.float32)
    goals_2d = goals.reshape(N, GOAL_DIM).astype(jnp.float32)
    # K-concat LHS: [image | goals], bf16 (MXU-native; half the DMA bytes)
    x = jnp.concatenate([img_2d, goals_2d], axis=-1).astype(jnp.bfloat16)

    vmem = lambda: pl.BlockSpec(memory_space=pltpu.MemorySpace.VMEM)
    flops = 2 * N * (LHS_K * HIDDEN + C0_K * HIDDEN + 5 * HIDDEN * HIDDEN)
    bytes_accessed = (x.size * 2 + w_packed.size * 2
                      + biases.size * 4 + N * HIDDEN * 4)

    out = pl.pallas_call(
        simple_network_kernel,
        out_shape=jax.ShapeDtypeStruct((N, HIDDEN), jnp.float32),
        # grid-less: every slab is one full block resident in VMEM (~70 KiB total)
        in_specs=[vmem(), vmem(), vmem()],
        out_specs=vmem(),
        cost_estimate=pl.CostEstimate(flops=flops, transcendentals=0,
                                      bytes_accessed=bytes_accessed),
    )(x, w_packed, biases)

    return out[:, :ACT_PRED_DIM].reshape(Bsz, Tlen, ACT_PRED_DIM)


# --------------------------- parameter creation ------------------------------
def make_params(key):
    """Raw (PyTorch-layout) parameters, 1-D biases."""
    def lin(key, fan_in, fan_out):
        kw, kb = jax.random.split(key)
        scale = 1.0 / np.sqrt(fan_in)
        w = jax.random.uniform(kw, (fan_in, fan_out), jnp.float32, -scale, scale)
        b = jax.random.uniform(kb, (fan_out,), jnp.float32, -scale, scale)
        return w, b

    keys = jax.random.split(key, 11)
    wg, bg = lin(keys[0], GOAL_DIM, HIDDEN)                  # embed_goal
    wbb, bbb = lin(keys[1], IMG_FLAT + HIDDEN, STATE_DIM)    # backbone projection
    wbb_img, wbb_goal = wbb[:IMG_FLAT], wbb[IMG_FLAT:]
    wrgb, brgb = lin(keys[2], STATE_DIM, HIDDEN)             # embed_rgb
    c0w, c0b = lin(keys[3], 2 * HIDDEN, HIDDEN)              # concat_input (depth 3)
    c0r, c0g = c0w[:HIDDEN], c0w[HIDDEN:]
    c1w, c1b = lin(keys[4], HIDDEN, HIDDEN)
    c2w, c2b = lin(keys[5], HIDDEN, HIDDEN)
    c3w, c3b = lin(keys[6], HIDDEN, HIDDEN)
    a0w, a0b = lin(keys[7], HIDDEN, HIDDEN)                  # action_head (depth 2)
    a1w, a1b = lin(keys[8], HIDDEN, HIDDEN)
    a2w, a2b = lin(keys[9], HIDDEN, ACT_PRED_DIM)

    return (wg, bg, wbb_img, wbb_goal, bbb, wrgb, brgb,
            c0r, c0g, c0b, c1w, c1b, c2w, c2b, c3w, c3b,
            a0w, a0b, a1w, a1b, a2w, a2b)


def pack_params(raw):
    """Exact linear folds + packing into 2 DMA slabs for the kernel."""
    (wg, bg, wbb_img, wbb_goal, bbb, wrgb, brgb,
     c0r, c0g, c0b, c1w, c1b, c2w, c2b, c3w, c3b,
     a0w, a0b, a1w, a1b, a2w, a2b) = raw

    # embed_goal folded into backbone goal-branch and concat_input[0] goal-branch
    w_goal_bb = wg @ wbb_goal                 # (GOAL_DIM, HIDDEN)
    b_bb = bg @ wbb_goal + bbb
    w_goal_c0 = wg @ c0g                      # (GOAL_DIM, HIDDEN)
    # embed_rgb (no ReLU after it) folded into concat_input[0] rgb-branch
    w_feat_c0 = wrgb @ c0r                    # (HIDDEN, HIDDEN)
    b_c0 = brgb @ c0r + bg @ c0g + c0b
    # c3 (no ReLU) folded into a0
    w_c3a0 = c3w @ a0w                        # (HIDDEN, HIDDEN)
    b_c3a0 = c3b @ a0w + a0b
    # a2 lane-padded to HIDDEN for a lane-dense output store
    a2w_pad = jnp.zeros((HIDDEN, HIDDEN), jnp.float32).at[:, :ACT_PRED_DIM].set(a2w)
    a2b_pad = jnp.zeros((HIDDEN,), jnp.float32).at[:ACT_PRED_DIM].set(a2b)

    # single bf16 weight slab, row layout documented at module top
    w_packed = jnp.concatenate(
        [wbb_img, w_goal_bb,            # rows   0:784  backbone K-concat RHS
         w_feat_c0, w_goal_c0,          # rows 784:832  concat_input[0] RHS
         c1w, c2w, w_c3a0, a1w, a2w_pad],  # rows 832:992
        axis=0).astype(jnp.bfloat16)    # (992, 32)
    assert w_packed.shape == (W_ROWS, HIDDEN)

    biases = jnp.stack([b_bb, b_c0, c1b, c2b, b_c3a0, a1b, a2b_pad])   # (7,32) f32
    return (w_packed, biases)


# ---------------------------- pure-JAX reference -----------------------------
def reference_forward(goals, rgb, raw):
    """Unfolded f32 math mirroring the PyTorch forward (verifies all folds)."""
    (wg, bg, wbb_img, wbb_goal, bbb, wrgb, brgb,
     c0r, c0g, c0b, c1w, c1b, c2w, c2b, c3w, c3b,
     a0w, a0b, a1w, a1b, a2w, a2b) = raw
    N = rgb.shape[0] * rgb.shape[1]
    g = goals.reshape(N, GOAL_DIM)
    x = rgb.reshape(N, IMG_FLAT)
    relu = lambda v: jnp.maximum(v, 0.0)

    goal_e = g @ wg + bg
    feat = relu(jnp.concatenate([x, goal_e], -1)
                @ jnp.concatenate([wbb_img, wbb_goal], 0) + bbb)
    rgb_e = feat @ wrgb + brgb
    body = jnp.concatenate([rgb_e, goal_e], -1)
    h = relu(body @ jnp.concatenate([c0r, c0g], 0) + c0b)
    h = relu(h @ c1w + c1b)
    h = relu(h @ c2w + c2b)
    obs = h @ c3w + c3b
    h = relu(obs @ a0w + a0b)
    h = relu(h @ a1w + a1b)
    out = h @ a2w + a2b
    return out.reshape(rgb.shape[0], rgb.shape[1], ACT_PRED_DIM)


if __name__ == "__main__":
    key = jax.random.PRNGKey(0)
    k_goal, k_img, k_param = jax.random.split(key, 3)

    goals = jax.random.normal(k_goal, (B, T, GOAL_DIM), jnp.float32)
    rgb = jax.random.normal(k_img, (B, T, C, H, W), jnp.float32)   # NCHW per timestep
    raw_params = make_params(k_param)
    packed_params = pack_params(raw_params)

    action_preds = simple_network_forward(goals, rgb, packed_params)
    action_preds = jax.block_until_ready(action_preds)

    ref = reference_forward(goals, rgb, raw_params)
    assert action_preds.shape == (B, T, ACT_PRED_DIM)
    # 2e-2: reference is pure f32 while the kernel uses bf16 MXU operands for a
    # 7-matmul chain (f32 accumulate); quantization drift is O(1e-2) worst case,
    # whereas any structural/fold error would be O(0.1+).
    assert np.allclose(np.asarray(action_preds), np.asarray(ref), atol=2e-2, rtol=2e-2)

    print("KERNEL_OK")
</pallas_src>

<mosaic_0001>
module attributes {stable_mosaic.version = 11 : i64} {
  func.func @simple_network_kernel(%arg0: memref<2x784xbf16, #tpu.memory_space<vmem>>, %arg1: memref<992x32xbf16, #tpu.memory_space<vmem>>, %arg2: memref<7x32xf32, #tpu.memory_space<vmem>>, %arg3: memref<2x32xf32, #tpu.memory_space<vmem>>) attributes {dimension_semantics = [], scalar_prefetch = 0 : i64, scratch_operands = 0 : i64, tpu.core_type = #tpu.core_type<tc>} {
    %c0 = arith.constant 0 : index
    %c0_0 = arith.constant 0 : index
    %0 = vector.load %arg2[%c0, %c0_0] : memref<7x32xf32, #tpu.memory_space<vmem>>, vector<7x32xf32>
    %c0_1 = arith.constant 0 : index
    %c0_2 = arith.constant 0 : index
    %1 = vector.load %arg0[%c0_1, %c0_2] : memref<2x784xbf16, #tpu.memory_space<vmem>>, vector<2x784xbf16>
    %c0_3 = arith.constant 0 : index
    %c0_4 = arith.constant 0 : index
    %2 = vector.load %arg1[%c0_3, %c0_4] : memref<992x32xbf16, #tpu.memory_space<vmem>>, vector<784x32xbf16>
    %cst = arith.constant dense<0.000000e+00> : vector<2x32xf32>
    %3 = tpu.matmul %1, %2, %cst {dimension_numbers = #tpu.dot_dimension_numbers<[1], [0], [0], [1], [0, 0, 1, 1], [], []>} : vector<2x784xbf16>, vector<784x32xbf16>, vector<2x32xf32> -> vector<2x32xf32>
    %4 = vector.extract_strided_slice %0 {offsets = [0, 0], sizes = [1, 32], strides = [1, 1]} : vector<7x32xf32> to vector<1x32xf32>
    %5 = vector.broadcast %4 : vector<1x32xf32> to vector<2x32xf32>
    %6 = arith.addf %3, %5 : vector<2x32xf32>
    %cst_5 = arith.constant 0.000000e+00 : f32
    %7 = vector.broadcast %cst_5 : f32 to vector<2x32xf32>
    %8 = arith.maximumf %6, %7 : vector<2x32xf32>
    %9 = arith.truncf %8 : vector<2x32xf32> to vector<2x32xbf16>
    %10 = vector.extract_strided_slice %1 {offsets = [0, 768], sizes = [2, 16], strides = [1, 1]} : vector<2x784xbf16> to vector<2x16xbf16>
    %11 = tpu.concatenate %9, %10 in 1 : vector<2x32xbf16>, vector<2x16xbf16> -> vector<2x48xbf16>
    %c784 = arith.constant 784 : index
    %c0_6 = arith.constant 0 : index
    %12 = vector.load %arg1[%c784, %c0_6] : memref<992x32xbf16, #tpu.memory_space<vmem>>, vector<48x32xbf16>
    %cst_7 = arith.constant dense<0.000000e+00> : vector<2x32xf32>
    %13 = tpu.matmul %11, %12, %cst_7 {dimension_numbers = #tpu.dot_dimension_numbers<[1], [0], [0], [1], [0, 0, 1, 1], [], []>} : vector<2x48xbf16>, vector<48x32xbf16>, vector<2x32xf32> -> vector<2x32xf32>
    %14 = vector.extract_strided_slice %0 {offsets = [1, 0], sizes = [1, 32], strides = [1, 1]} : vector<7x32xf32> to vector<1x32xf32>
    %15 = vector.broadcast %14 : vector<1x32xf32> to vector<2x32xf32>
    %16 = arith.addf %13, %15 : vector<2x32xf32>
    %cst_8 = arith.constant 0.000000e+00 : f32
    %17 = vector.broadcast %cst_8 : f32 to vector<2x32xf32>
    %18 = arith.maximumf %16, %17 : vector<2x32xf32>
    %19 = arith.truncf %18 : vector<2x32xf32> to vector<2x32xbf16>
    %c832 = arith.constant 832 : index
    %c0_9 = arith.constant 0 : index
    %20 = vector.load %arg1[%c832, %c0_9] : memref<992x32xbf16, #tpu.memory_space<vmem>>, vector<32x32xbf16>
    %cst_10 = arith.constant dense<0.000000e+00> : vector<2x32xf32>
    %21 = tpu.matmul %19, %20, %cst_10 {dimension_numbers = #tpu.dot_dimension_numbers<[1], [0], [0], [1], [0, 0, 1, 1], [], []>} : vector<2x32xbf16>, vector<32x32xbf16>, vector<2x32xf32> -> vector<2x32xf32>
    %22 = vector.extract_strided_slice %0 {offsets = [2, 0], sizes = [1, 32], strides = [1, 1]} : vector<7x32xf32> to vector<1x32xf32>
    %23 = vector.broadcast %22 : vector<1x32xf32> to vector<2x32xf32>
    %24 = arith.addf %21, %23 : vector<2x32xf32>
    %cst_11 = arith.constant 0.000000e+00 : f32
    %25 = vector.broadcast %cst_11 : f32 to vector<2x32xf32>
    %26 = arith.maximumf %24, %25 : vector<2x32xf32>
    %27 = arith.truncf %26 : vector<2x32xf32> to vector<2x32xbf16>
    %c864 = arith.constant 864 : index
    %c0_12 = arith.constant 0 : index
    %28 = vector.load %arg1[%c864, %c0_12] : memref<992x32xbf16, #tpu.memory_space<vmem>>, vector<32x32xbf16>
    %cst_13 = arith.constant dense<0.000000e+00> : vector<2x32xf32>
    %29 = tpu.matmul %27, %28, %cst_13 {dimension_numbers = #tpu.dot_dimension_numbers<[1], [0], [0], [1], [0, 0, 1, 1], [], []>} : vector<2x32xbf16>, vector<32x32xbf16>, vector<2x32xf32> -> vector<2x32xf32>
    %30 = vector.extract_strided_slice %0 {offsets = [3, 0], sizes = [1, 32], strides = [1, 1]} : vector<7x32xf32> to vector<1x32xf32>
    %31 = vector.broadcast %30 : vector<1x32xf32> to vector<2x32xf32>
    %32 = arith.addf %29, %31 : vector<2x32xf32>
    %cst_14 = arith.constant 0.000000e+00 : f32
    %33 = vector.broadcast %cst_14 : f32 to vector<2x32xf32>
    %34 = arith.maximumf %32, %33 : vector<2x32xf32>
    %35 = arith.truncf %34 : vector<2x32xf32> to vector<2x32xbf16>
    %c896 = arith.constant 896 : index
    %c0_15 = arith.constant 0 : index
    %36 = vector.load %arg1[%c896, %c0_15] : memref<992x32xbf16, #tpu.memory_space<vmem>>, vector<32x32xbf16>
    %cst_16 = arith.constant dense<0.000000e+00> : vector<2x32xf32>
    %37 = tpu.matmul %35, %36, %cst_16 {dimension_numbers = #tpu.dot_dimension_numbers<[1], [0], [0], [1], [0, 0, 1, 1], [], []>} : vector<2x32xbf16>, vector<32x32xbf16>, vector<2x32xf32> -> vector<2x32xf32>
    %38 = vector.extract_strided_slice %0 {offsets = [4, 0], sizes = [1, 32], strides = [1, 1]} : vector<7x32xf32> to vector<1x32xf32>
    %39 = vector.broadcast %38 : vector<1x32xf32> to vector<2x32xf32>
    %40 = arith.addf %37, %39 : vector<2x32xf32>
    %cst_17 = arith.constant 0.000000e+00 : f32
    %41 = vector.broadcast %cst_17 : f32 to vector<2x32xf32>
    %42 = arith.maximumf %40, %41 : vector<2x32xf32>
    %43 = arith.truncf %42 : vector<2x32xf32> to vector<2x32xbf16>
    %c928 = arith.constant 928 : index
    %c0_18 = arith.constant 0 : index
    %44 = vector.load %arg1[%c928, %c0_18] : memref<992x32xbf16, #tpu.memory_space<vmem>>, vector<32x32xbf16>
    %cst_19 = arith.constant dense<0.000000e+00> : vector<2x32xf32>
    %45 = tpu.matmul %43, %44, %cst_19 {dimension_numbers = #tpu.dot_dimension_numbers<[1], [0], [0], [1], [0, 0, 1, 1], [], []>} : vector<2x32xbf16>, vector<32x32xbf16>, vector<2x32xf32> -> vector<2x32xf32>
    %46 = vector.extract_strided_slice %0 {offsets = [5, 0], sizes = [1, 32], strides = [1, 1]} : vector<7x32xf32> to vector<1x32xf32>
    %47 = vector.broadcast %46 : vector<1x32xf32> to vector<2x32xf32>
    %48 = arith.addf %45, %47 : vector<2x32xf32>
    %cst_20 = arith.constant 0.000000e+00 : f32
    %49 = vector.broadcast %cst_20 : f32 to vector<2x32xf32>
    %50 = arith.maximumf %48, %49 : vector<2x32xf32>
    %51 = arith.truncf %50 : vector<2x32xf32> to vector<2x32xbf16>
    %c960 = arith.constant 960 : index
    %c0_21 = arith.constant 0 : index
    %52 = vector.load %arg1[%c960, %c0_21] : memref<992x32xbf16, #tpu.memory_space<vmem>>, vector<32x32xbf16>
    %cst_22 = arith.constant dense<0.000000e+00> : vector<2x32xf32>
    %53 = tpu.matmul %51, %52, %cst_22 {dimension_numbers = #tpu.dot_dimension_numbers<[1], [0], [0], [1], [0, 0, 1, 1], [], []>} : vector<2x32xbf16>, vector<32x32xbf16>, vector<2x32xf32> -> vector<2x32xf32>
    %54 = vector.extract_strided_slice %0 {offsets = [6, 0], sizes = [1, 32], strides = [1, 1]} : vector<7x32xf32> to vector<1x32xf32>
    %55 = vector.broadcast %54 : vector<1x32xf32> to vector<2x32xf32>
    %56 = arith.addf %53, %55 : vector<2x32xf32>
    %c0_23 = arith.constant 0 : index
    %c0_24 = arith.constant 0 : index
    %57 = vector.load %arg3[%c0_23, %c0_24] : memref<2x32xf32, #tpu.memory_space<vmem>>, vector<2x32xf32>
    tpu.vector_store %arg3[%c0_23, %c0_24], %56 {strides = array<i32>} : memref<2x32xf32, #tpu.memory_space<vmem>>, vector<2x32xf32>,
    return
  }
}

</mosaic_0001>

<bundles_post_ra>
// kernel: tpu_custom_call.1
= control target key start
LH: loop header
LB: loop body
LE: loop exit
PB: predicated region body
PF: predicated region fallthrough
CT: control target
= control target key end

     0   :  { %v116_v29 = vlaneseq  ;;  %v1357_v34 = vmov 1966171168   ;;  %v1358_v40 = vmov 0.0   ;;  %s1359_s29 = smov 32   ;;  %vm1360_vm0 = vmmov 0   ;;  %s1639_s0 = inlined_call_operand.vmem [shape: bf16[2,784], index: 0, kind: input, shape index: {}]   ;;  %s1640_s1 = inlined_call_operand.vmem [shape: bf16[992,32], index: 1, kind: input, shape index: {}]   ;;  %s1641_s2 = inlined_call_operand.vmem [shape: f32[7,32], index: 2, kind: input, shape index: {}]   ;;  %s1642_s3 = inlined_call_operand.hbm [shape: f32[2,32], index: 3, kind: output, shape index: {}]  }
   0x1   :  { %v1270_v0 = vld [vmem:[%s1640_s1 + $0x40] sm:$0xff]   ;;  %v1274_v4 = vld [vmem:[%s1640_s1 + $0x48] sm:$0xff]   ;;  %v1278_v8 = vld [vmem:[%s1640_s1 + $0x50] sm:$0xff]   ;;  %v123_v35 = vunpack.c.l.s4 %v1357_v34  ;;  %vm469_vm1 = vcmask 130048  }
   0x2   :  { %v1271_v1 = vld [vmem:[%s1640_s1] sm:$0xff]   ;;  %1122 = vmatprep.subr.bf16.mxu0 %v1270_v0  ;;  %v1275_v5 = vld [vmem:[%s1640_s1 + $0x8] sm:$0xff]   ;;  %v1279_v9 = vld [vmem:[%s1640_s1 + $0x10] sm:$0xff]   ;;  %v1478_v33 = vshrl.u32 %v116_v29, 7 }
   0x3   :  { %v1272_v2 = vld [vmem:[%s1640_s1 + $0xc0] sm:$0xff]   ;;  %1123 = vmatpush3.bf16.msra.mxu0 %v1271_v1  ;;  %v1276_v6 = vld [vmem:[%s1640_s1 + $0xc8] sm:$0xff]   ;;  %v1280_v10 = vld [vmem:[%s1640_s1 + $0xd0] sm:$0xff]   ;;  %v124_v39 = vunpack.c.0.s8 %v123_v35 }
   0x4   :  { %v1273_v3 = vld [vmem:[%s1640_s1 + $0x80] sm:$0xff]   ;;  %1144 = vmatprep.subr.bf16.mxu1 %v1272_v2  ;;  %1124 = vmatprep.subr.bf16.mxu0 %v1274_v4  ;;  %v1277_v7 = vld [vmem:[%s1640_s1 + $0x88] sm:$0xff]   ;;  %v1281_v11 = vld [vmem:[%s1640_s1 + $0x90] sm:$0xff]  }
   0x5   :  { %1145 = vmatpush3.bf16.msra.mxu1 %v1273_v3  ;;  %v1282_v12 = vld [vmem:[%s1640_s1 + $0x58] sm:$0xff]   ;;  %v1286_v16 = vld [vmem:[%s1640_s1 + $0x60] sm:$0xff]   ;;  %v1290_v20 = vld [vmem:[%s1640_s1 + $0x68] sm:$0xff]   ;;  %v127_v41 = vsub.s32 %v124_v39, %v1478_v33 }
   0x6   :  { %1146 = vmatprep.subr.bf16.mxu1 %v1276_v6  ;;  %v1283_v13 = vld [vmem:[%s1640_s1 + $0x18] sm:$0xff]   ;;  %v1287_v17 = vld [vmem:[%s1640_s1 + $0x20] sm:$0xff]   ;;  %v1291_v21 = vld [vmem:[%s1640_s1 + $0x28] sm:$0xff]  }
   0x7   :  { %1125 = vmatpush3.bf16.msra.mxu0 %v1275_v5  ;;  %v1284_v14 = vld [vmem:[%s1640_s1 + $0xd8] sm:$0xff]   ;;  %v1288_v18 = vld [vmem:[%s1640_s1 + $0xe0] sm:$0xff]   ;;  %v1292_v22 = vld [vmem:[%s1640_s1 + $0xe8] sm:$0xff]  }
   0x8   :  { %1126 = vmatprep.subr.bf16.mxu0 %v1278_v8  ;;  %v1285_v15 = vld [vmem:[%s1640_s1 + $0x98] sm:$0xff]   ;;  %v1289_v19 = vld [vmem:[%s1640_s1 + $0xa0] sm:$0xff]   ;;  %v1293_v23 = vld [vmem:[%s1640_s1 + $0xa8] sm:$0xff]  }
   0x9   :  { %1147 = vmatpush3.bf16.msra.mxu1 %v1277_v7  ;;  %v1294_v24 = vld [vmem:[%s1640_s1 + $0x70] sm:$0xff]   ;;  %v1298_v28 = vld [vmem:[%s1640_s1 + $0x78] sm:$0xff]   ;;  %v17_v32 = vld [vmem:[%s1639_s0] sm:$0x7f] }
   0xa   :  { %1148 = vmatprep.subr.bf16.mxu1 %v1280_v10  ;;  %v1295_v25 = vld [vmem:[%s1640_s1 + $0x30] sm:$0xff]   ;;  %v1299_v30 = vld [vmem:[%s1640_s1 + $0x38] sm:$0xff]   ;;  %v1303_v37 = vld [vmem:[%s1640_s1 + $0x140] sm:$0xff]   ;;  %v121_v38 = vcombine.high %v17_v32, %v17_v32  ;;  %v128_v42 = vrot.slane %v17_v32, %v127_v41 }
   0xb   :  { %1127 = vmatpush3.bf16.msra.mxu0 %v1279_v9  ;;  %v1296_v26 = vld [vmem:[%s1640_s1 + $0xf0] sm:$0xff]   ;;  %v1300_v31 = vld [vmem:[%s1640_s1 + $0xf8] sm:$0xff]   ;;  %v1304_v49 = vld [vmem:[%s1640_s1 + $0x100] sm:$0xff]  }
   0xc   :  { %1128 = vmatprep.subr.bf16.mxu0 %v1282_v12  ;;  %v1297_v27 = vld [vmem:[%s1640_s1 + $0xb0] sm:$0xff]   ;;  %v1302_v36 = vld [vmem:[%s1640_s1 + $0xb8] sm:$0xff]   ;;  %v135_v43 = vrot.slane %v121_v38, %v127_v41  ;;  %v136_v44 = vcombine.high %v128_v42, %v128_v42  ;;  %v144_v45 = vrot.slane %v128_v42, %v127_v41  ;;  %v1305_v52 = vld [vmem:[%s1640_s1 + $0x148] sm:$0xff]  }
   0xd   :  { %1149 = vmatpush3.bf16.msra.mxu1 %v1281_v11  ;;  %v1306_v55 = vld [vmem:[%s1640_s1 + $0x108] sm:$0xff]   ;;  %v1307_v56 = vld [vmem:[%s1640_s1 + $0x150] sm:$0xff]   ;;  %v1309_v58 = vld [vmem:[%s1640_s1 + $0x158] sm:$0xff]  }
   0xe   :  { %1150 = vmatprep.subr.bf16.mxu1 %v1284_v14  ;;  %v137_v46 = vcombine.high %v135_v43, %v135_v43  ;;  %v151_v47 = vrot.slane %v135_v43, %v127_v41  ;;  %v158_v48 = vrot.slane %v136_v44, %v127_v41  ;;  %v166_v51 = vcombine.high %v144_v45, %v144_v45  ;;  %v1308_v57 = vld [vmem:[%s1640_s1 + $0x110] sm:$0xff]   ;;  %v1319_v59 = vld [vmem:[%s1640_s1 + $0x180] sm:$0xff]   ;;  %v1310_v60 = vld [vmem:[%s1640_s1 + $0x118] sm:$0xff]  }
   0xf   :  { %1129 = vmatpush3.bf16.msra.mxu0 %v1283_v13  ;;  %v1311_v61 = vld [vmem:[%s1640_s1 + $0x160] sm:$0xff]  }
  0x10   :  { %1130 = vmatprep.subr.bf16.mxu0 %v1286_v16  ;;  %v167_v50 = vcombine.high %v151_v47, %v151_v47  ;;  %505 = vmatprep.mubr.bf16.mxu0 %v158_v48  ;;  %v168_v53 = vcombine.high %v158_v48, %v158_v48  ;;  %v165_v54 = vrot.slane %v137_v46, %v127_v41  ;;  %v1312_v62 = vld [vmem:[%s1640_s1 + $0x120] sm:$0xff]  }
  0x11   :  { %1151 = vmatpush3.bf16.msra.mxu1 %v1285_v15 }
  0x12   :  { %1152 = vmatprep.subr.bf16.mxu1 %v1288_v18  ;;  %635 = vrot.lane.b32.xlu0 %v167_v50, %s1359_s29 }
  0x13   :  { %1131 = vmatpush3.bf16.msra.mxu0 %v1287_v17  ;;  %545 = vmatprep.mubr.bf16.mxu1 %v168_v53 }
  0x14   :  { %1132 = vmatprep.subr.bf16.mxu0 %v1290_v20 }
  0x15   :  { %1153 = vmatpush3.bf16.msra.mxu1 %v1289_v19 }
  0x16   :  { %1154 = vmatprep.subr.bf16.mxu1 %v1292_v22 }
  0x17   :  { %1133 = vmatpush3.bf16.msra.mxu0 %v1291_v21 }
  0x18   :  { %1134 = vmatprep.subr.bf16.mxu0 %v1294_v24 }
  0x19   :  { %1155 = vmatpush3.bf16.msra.mxu1 %v1293_v23 }
  0x1a   :  { %1156 = vmatprep.subr.bf16.mxu1 %v1296_v26 }
  0x1b   :  { %1135 = vmatpush3.bf16.msra.mxu0 %v1295_v25 }
  0x1c   :  { %1136 = vmatprep.subr.bf16.mxu0 %v1298_v28 }
  0x1d   :  { %1157 = vmatpush3.bf16.msra.mxu1 %v1297_v27 }
  0x1e   :  { %1158 = vmatprep.subr.bf16.mxu1 %v1300_v31 }
  0x1f   :  { %1137 = vmatpush3.bf16.msra.mxu0 %v1299_v30 }
  0x20   :  { %1166 = vmatprep.subr.bf16.mxu0 %v1303_v37 }
  0x21   :  { %1159 = vmatpush3.bf16.msra.mxu1 %v1302_v36 }
  0x22   :  { %1209 = vmatprep.subr.bf16.mxu1 %v1358_v40  ;;  %506 = vmatmul.mubr.bf16.vlgmr.msra.gmra.mrb[0].mxu0 %v144_v45 }
  0x23   :  { %1167 = vmatpush3.bf16.msra.mxu0 %v1304_v49  ;;  %585 = vmatprep.mubr.bf16.mxu0 %v165_v54 }
  0x24   :  { %546 = vmatmul.mubr.bf16.vlgmr.msra.gmra.mrb[0].mxu1 %v166_v51  ;;  %1168 = vmatprep.subr.bf16.mxu0 %v1305_v52 }
  0x25   :  { %1211 = vmatprep.mubr.msk.bf16.mxu1 %vm1360_vm0, %v1358_v40  ;;  %1210 = vmatpush3.bf16.msra.mxu1 %v1319_v59 }
  0x26   :  { %1215 = vmatprep.subr.bf16.mxu1 %v1358_v40 }
  0x27   :  { %1169 = vmatpush3.bf16.msra.mxu0 %v1306_v55 }
  0x28   :  { %1170 = vmatprep.subr.bf16.mxu0 %v1307_v56 }
  0x2b   :  { %1171 = vmatpush3.bf16.msra.mxu0 %v1308_v57 }
  0x2c   :  { %1172 = vmatprep.subr.bf16.mxu0 %v1309_v58  ;;  %1212 = vmatmul.mubr.msk.bf16.vlgmr.msra.gmra.mrb[4].mxu1 %vm469_vm1, %v167_v50 }
  0x2d   :  { %1221 = vmatprep.mubr.msk.bf16.mxu1 %vm1360_vm0, %v1358_v40 }
  0x2f   :  { %1173 = vmatpush3.bf16.msra.mxu0 %v1310_v60 }
  0x30   :  { %8 = vsyncpa [#allocation3], 0  ;;  %1174 = vmatprep.subr.bf16.mxu0 %v1311_v61  ;;  %v1313_v63 = vld [vmem:[%s1640_s1 + $0x168] sm:$0xff]   ;;  %v1315_v1 = vld [vmem:[%s1640_s1 + $0x170] sm:$0xff]   ;;  %v118_v8 = vsub.s32 0, %v1478_v33  ;;  %vm637_vm2 = vcmask 261120  }
  0x31   :  { %v1314_v0 = vld [vmem:[%s1640_s1 + $0x128] sm:$0xff]   ;;  %v1316_v2 = vld [vmem:[%s1640_s1 + $0x130] sm:$0xff]   ;;  %v1317_v3 = vld [vmem:[%s1640_s1 + $0x178] sm:$0xff]   ;;  %vm669_vm3 = vcmask 392192   ;;  %v649_v42 = vsub.s32 1, %v1478_v33  ;;  %v720_v54 = vsub.s32 2, %v1478_v33 }
  0x32   :  { %v1318_v4 = vld [vmem:[%s1640_s1 + $0x138] sm:$0xff]   ;;  %v1320_v5 = vld [vmem:[%s1640_s1 + $0x188] sm:$0xff]   ;;  %v1321_v6 = vld [vmem:[%s1640_s1 + $0x190] sm:$0xff]   ;;  %s1361_s29 = smov [#allocation2]   ;;  %vm1037_vm4 = vcmask 254976  }
  0x33   :  { %1175 = vmatpush3.bf16.msra.mxu0 %v1312_v62  ;;  %1216 = vmatpush3.bf16.msra.mxu1 %v1320_v5  ;;  %v1322_v7 = vld [vmem:[%s1640_s1 + $0x198] sm:$0xff]   ;;  %v1560_v9 = vld [vmem:[%s1641_s2] sm:$0x7f]  ;;  %v1324_v41 = vld [vmem:[%s1640_s1 + $0x1a8] sm:$0xff]  }
  0x34   :  { %1176 = vmatprep.subr.bf16.mxu0 %v1313_v63  ;;  %1217 = vmatprep.subr.bf16.mxu1 %v1358_v40  ;;  %v119_v11 = vrot.slane %v1560_v9, %v118_v8  ;;  %v1323_v38 = vld [vmem:[%s1640_s1 + $0x1a0] sm:$0xff]   ;;  %v650_v43 = vrot.slane %v1560_v9, %v649_v42  ;;  %v1325_v50 = vld [vmem:[%s1640_s1 + $0x1b0] sm:$0xff]   ;;  %v1326_v52 = vld [vmem:[%s1640_s1 + $0x1b8] sm:$0xff]   ;;  %v721_v55 = vrot.slane %v1560_v9, %v720_v54 }
  0x35   :  { %v1327_v53 = vld [vmem:[%s1640_s1 + $0x1c0] sm:$0xff]   ;;  %v1328_v63 = vld [vmem:[%s1640_s1 + $0x1c8] sm:$0xff]  }
  0x37   :  { %1177 = vmatpush3.bf16.msra.mxu0 %v1314_v0  ;;  %1218 = vmatpush3.bf16.msra.mxu1 %v1321_v6  ;;  %v1329_v0 = vld [vmem:[%s1640_s1 + $0x1d0] sm:$0xff]  }
  0x38   :  { %1178 = vmatprep.subr.bf16.mxu0 %v1315_v1  ;;  %1219 = vmatprep.subr.bf16.mxu1 %v1358_v40  ;;  %v785_v1 = vsub.s32 3, %v1478_v33 }
  0x3b   :  { %1179 = vmatpush3.bf16.msra.mxu0 %v1316_v2  ;;  %1220 = vmatpush3.bf16.msra.mxu1 %v1322_v7  ;;  %v786_v2 = vrot.slane %v1560_v9, %v785_v1 }
  0x3c   :  { %1180 = vmatprep.subr.bf16.mxu0 %v1317_v3  ;;  %1225 = vmatprep.subr.bf16.mxu1 %v1358_v40 }
  0x3f   :  { %1181 = vmatpush3.bf16.msra.mxu0 %v1318_v4 }
  0x40   :  { %1241 = vmatprep.subr.bf16.mxu0 %v1358_v40 }
  0x42   :  { %586 = vmatmul.mubr.bf16.vlgmr.msra.gmra.mrb[4].mxu0 %v151_v47 }
  0x43   :  { %1245 = vmatprep.mubr.msk.bf16.mxu0 %vm1360_vm0, %v1358_v40  ;;  %1242 = vmatpush3.bf16.msra.mxu0 %v1327_v53 }
  0x44   :  { %1243 = vmatprep.subr.bf16.mxu0 %v1358_v40 }
  0x47   :  { %1244 = vmatpush3.bf16.msra.mxu0 %v1328_v63 }
  0x48   :  { %1257 = vmatprep.subr.bf16.mxu0 %v1358_v40 }
  0x84   :  { %v636_v36 = vpop.permute.xlu0 %635 }
  0xf5   :  { %v1138_v10 = vpop.f32.mrb[0].mxu0 }
  0xf6   :  { %v1139_v12 = vpop.f32.mrb[1].mxu0 }
  0xf7   :  { %v1140_v13 = vadd.f32 %v1139_v12, %v1138_v10  ;;  %v1141_v14 = vpop.f32.mrb[2].mxu0  ;;  %v1160_v15 = vpop.f32.mrb[0].mxu1  ;;  %v1331_v12 = vld [vmem:[%s1640_s1 + $0x1e0] sm:$0xff]  }
  0xf8   :  { %v1142_v16 = vpop.f32.mrb[3].mxu0  ;;  %v1161_v17 = vpop.f32.mrb[1].mxu1 }
  0xf9   :  { %v508_v18 = vadd.f32 %v1140_v13, %v119_v11  ;;  %v1162_v19 = vadd.f32 %v1161_v17, %v1160_v15  ;;  %v1163_v20 = vpop.f32.mrb[2].mxu1  ;;  %v1330_v11 = vld [vmem:[%s1640_s1 + $0x1d8] sm:$0xff]   ;;  %v850_v13 = vsub.s32 4, %v1478_v33 }
  0xfa   :  { %v1164_v21 = vpop.f32.mrb[3].mxu1 }
  0xfb   :  { %v548_v22 = vadd.f32 %v1162_v19, %v508_v18  ;;  %v851_v14 = vrot.slane %v1560_v9, %v850_v13 }
  0xff   :  { %v627_v23 = vpop.f32.mrb[4].mxu1 }
 0x100   :  { %v1213_v24 = vpop.f32.mrb[5].mxu1 }
 0x101   :  { %v630_v25 = vpop.f32.mrb[6].mxu1 }
 0x102   :  { %v1214_v26 = vpop.f32.mrb[7].mxu1 }
 0x115   :  { %v1182_v27 = vpop.f32.mrb[4].mxu0 }
 0x116   :  { %v1183_v28 = vpop.f32.mrb[5].mxu0 }
 0x117   :  { %v1184_v29 = vadd.f32 %v1183_v28, %v1182_v27  ;;  %v1185_v30 = vpop.f32.mrb[6].mxu0 }
 0x118   :  { %v1186_v31 = vpop.f32.mrb[7].mxu0 }
 0x119   :  { %v588_v32 = vadd.f32 %v1184_v29, %v548_v22  ;;  %v1332_v22 = vld [vmem:[%s1640_s1 + $0x1e8] sm:$0xff]   ;;  %v980_v31 = vsub.s32 6, %v1478_v33  ;;  %s1045_s1 = sshll.u32 %s1361_s29, 4  ;;  %s1046_s1 = int_to_ptr.vmem [resolvable:$true] %s1045_s1 }
 0x11a   :  { %s1333_s30 = scalar_lea.vmem %s1046_s1, 32  ;;  %p1338_p1 = scmp.lt.s32.totalorder %s1046_s1, %s1046_s1 }
 0x11b   :  { %v628_v34 = vadd.f32 %v627_v23, %v588_v32  ;;  %v981_v32 = vrot.slane %v1560_v9, %v980_v31  ;;  %p1334_p0 = scmp.ne.s32.totalorder %s1046_s1, %s1333_s30  ;;  %p1339_p2 = scmp.lt.s32.totalorder %s1333_s30, %s1333_s30 }
 0x11d   :  { %v633_v35 = vmax.f32 %v628_v34, 0.0  ;;  %p1340_p3 = por %p1339_p2, %p1338_p1 }
 0x11f   :  { %v634_v37 = vpack.c.bf16 %v633_v35, %v633_v35  ;;  %p1341_p4 = pnand %p1340_p3, %p1334_p0 }
 0x121   :  { %v640_v39 = vsel %vm637_vm2, %v634_v37, %v636_v36 }
 0x122   :  { %1222 = vmatmul.mubr.msk.bf16.vlgmr.msra.gmra.mrb[8].mxu1 %vm669_vm3, %v640_v39 }
 0x123   :  { %1226 = vmatpush3.bf16.msra.mxu1 %v1323_v38  ;;  %1229 = vmatprep.mubr.msk.bf16.mxu1 %vm1360_vm0, %v1358_v40 }
 0x124   :  { %1227 = vmatprep.subr.bf16.mxu1 %v1358_v40 }
 0x127   :  { %1228 = vmatpush3.bf16.msra.mxu1 %v1324_v41 }
 0x128   :  { %1233 = vmatprep.subr.bf16.mxu1 %v1358_v40 }
 0x1f5   :  { %v706_v44 = vpop.f32.mrb[8].mxu1 }
 0x1f6   :  { %v707_v45 = vadd.f32 %v706_v44, %v650_v43  ;;  %v1223_v46 = vpop.f32.mrb[9].mxu1 }
 0x1f7   :  { %v709_v47 = vpop.f32.mrb[10].mxu1 }
 0x1f8   :  { %v712_v48 = vmax.f32 %v707_v45, 0.0  ;;  %v1224_v49 = vpop.f32.mrb[11].mxu1 }
 0x1fa   :  { %v713_v51 = vpack.c.bf16 %v712_v48, %v712_v48 }
 0x1fc   :  { %1230 = vmatmul.mubr.msk.bf16.vlgmr.msra.gmra.mrb[12].mxu1 %vm637_vm2, %v713_v51 }
 0x1fd   :  { %1234 = vmatpush3.bf16.msra.mxu1 %v1325_v50  ;;  %1237 = vmatprep.mubr.msk.bf16.mxu1 %vm1360_vm0, %v1358_v40 }
 0x1fe   :  { %1235 = vmatprep.subr.bf16.mxu1 %v1358_v40 }
 0x201   :  { %1236 = vmatpush3.bf16.msra.mxu1 %v1326_v52 }
 0x202   :  { %1249 = vmatprep.subr.bf16.mxu1 %v1358_v40 }
 0x2cf   :  { %v771_v56 = vpop.f32.mrb[12].mxu1 }
 0x2d0   :  { %v772_v57 = vadd.f32 %v771_v56, %v721_v55  ;;  %v1231_v58 = vpop.f32.mrb[13].mxu1 }
 0x2d1   :  { %v774_v59 = vpop.f32.mrb[14].mxu1 }
 0x2d2   :  { %v777_v60 = vmax.f32 %v772_v57, 0.0  ;;  %v1232_v61 = vpop.f32.mrb[15].mxu1 }
 0x2d4   :  { %v778_v62 = vpack.c.bf16 %v777_v60, %v777_v60 }
 0x2d6   :  { %1238 = vmatmul.mubr.msk.bf16.vlgmr.msra.gmra.mrb[16].mxu1 %vm637_vm2, %v778_v62 }
 0x2d7   :  { %1253 = vmatprep.mubr.msk.bf16.mxu1 %vm1360_vm0, %v1358_v40  ;;  %1250 = vmatpush3.bf16.msra.mxu1 %v1329_v0 }
 0x2d8   :  { %1251 = vmatprep.subr.bf16.mxu1 %v1358_v40 }
 0x2db   :  { %1252 = vmatpush3.bf16.msra.mxu1 %v1330_v11 }
 0x3a9   :  { %v836_v3 = vpop.f32.mrb[16].mxu1 }
 0x3aa   :  { %v837_v4 = vadd.f32 %v836_v3, %v786_v2  ;;  %v1239_v5 = vpop.f32.mrb[17].mxu1 }
 0x3ab   :  { %v839_v6 = vpop.f32.mrb[18].mxu1 }
 0x3ac   :  { %v842_v7 = vmax.f32 %v837_v4, 0.0  ;;  %v1240_v8 = vpop.f32.mrb[19].mxu1 }
 0x3ae   :  { %v843_v10 = vpack.c.bf16 %v842_v7, %v842_v7 }
 0x3b0   :  { %1246 = vmatmul.mubr.msk.bf16.vlgmr.msra.gmra.mrb[8].mxu0 %vm637_vm2, %v843_v10 }
 0x3b1   :  { %1261 = vmatprep.mubr.msk.bf16.mxu0 %vm1360_vm0, %v1358_v40  ;;  %1258 = vmatpush3.bf16.msra.mxu0 %v1331_v12 }
 0x3b2   :  { %1259 = vmatprep.subr.bf16.mxu0 %v1358_v40  ;;  %v915_v40 = vsub.s32 5, %v1478_v33 }
 0x3b4   :  { %v916_v23 = vrot.slane %v1560_v9, %v915_v40 }
 0x3b5   :  { %1260 = vmatpush3.bf16.msra.mxu0 %v1332_v22 }
 0x483   :  { %v901_v15 = vpop.f32.mrb[8].mxu0 }
 0x484   :  { %v902_v16 = vadd.f32 %v901_v15, %v851_v14  ;;  %v1247_v17 = vpop.f32.mrb[9].mxu0 }
 0x485   :  { %v904_v18 = vpop.f32.mrb[10].mxu0 }
 0x486   :  { %v907_v19 = vmax.f32 %v902_v16, 0.0  ;;  %v1248_v20 = vpop.f32.mrb[11].mxu0 }
 0x488   :  { %v908_v21 = vpack.c.bf16 %v907_v19, %v907_v19 }
 0x48a   :  { %1254 = vmatmul.mubr.msk.bf16.vlgmr.msra.gmra.mrb[20].mxu1 %vm637_vm2, %v908_v21 }
 0x55d   :  { %v966_v24 = vpop.f32.mrb[20].mxu1 }
 0x55e   :  { %v967_v25 = vadd.f32 %v966_v24, %v916_v23  ;;  %v1255_v26 = vpop.f32.mrb[21].mxu1 }
 0x55f   :  { %v969_v27 = vpop.f32.mrb[22].mxu1 }
 0x560   :  { %v972_v28 = vmax.f32 %v967_v25, 0.0  ;;  %v1256_v29 = vpop.f32.mrb[23].mxu1 }
 0x562   :  { %v973_v30 = vpack.c.bf16 %v972_v28, %v972_v28 }
 0x564   :  { %1262 = vmatmul.mubr.msk.bf16.vlgmr.msra.gmra.mrb[12].mxu0 %vm637_vm2, %v973_v30 }
 0x637   :  { %v1031_v34 = vpop.f32.mrb[12].mxu0 }
 0x638   :  { %v1032_v35 = vadd.f32 %v1031_v34, %v981_v32  ;;  %v1263_v36 = vpop.f32.mrb[13].mxu0 }
 0x639   :  { %v1034_v37 = vpop.f32.mrb[14].mxu0 }
 0x63a   :  { %v1264_v38 = vpop.f32.mrb[15].mxu0  ;;  %1038 = vst.msk [vmem:[#allocation2] sm:$0x3] %vm1037_vm4, %v1032_v35 }
 0x63b   :  { %1344 = shalt.err (!%p1341_p4)
}
 0x63c   :  { %s1345_s6 = scalar_lea.hbm %s1642_s3, 32 }
 0x63d   :  { %p1346_p5 = scmp.ne.s32.totalorder %s1642_s3, %s1345_s6  ;;  %p1349_p6 = scmp.lt.u32.totalorder %s1345_s6, %s1642_s3 }
 0x63f   :  { %p1351_p7 = pnand %p1349_p6, %p1346_p5 }
 0x641   :  { %1354 = shalt.err (!%p1351_p7)
}
 0x642   :  { %1048 = dma.vmem_to_hbm [thread:$0]  %s1046_s1, 32, %s1642_s3, [#allocation3]  }
 0x643   :  { %1355 = dma.done.wait [#allocation3], 32  }
 0x644   :  { %1356 = vsyncadd [#allocation3], 4294967264 }
 0x645   :  { %1052 = vsyncpa [#allocation3], 1 }

</bundles_post_ra>
